<compile_context>
chip_gen: v6e
topology: v6e:2x2x1
jax: 0.10.0
libtpu: 0.0.40
codegen_flags: <defaults>
</compile_context>

<pallas_src>
import functools

import numpy as np

import jax
import jax.numpy as jnp
from jax import lax
from jax.experimental import pallas as pl
from jax.experimental.pallas import tpu as pltpu

LANE = 128
LANE_BITS = 7          # log2(LANE)
SUBLANE = 8


# ----------------------------------------------------------------------------
# One-time probe: orient pltpu.roll's rotation convention (np.roll has
# result[i] = x[(i - shift) % size]); the kernel self-calibrates either way.
# ----------------------------------------------------------------------------
def _roll_probe_kernel(x_ref, o_ref):
    o_ref[...] = pltpu.roll(x_ref[...], 1, 1)


@functools.lru_cache(maxsize=None)
def _roll_matches_np() -> bool:
    x = jnp.broadcast_to(jnp.arange(LANE, dtype=jnp.float32)[None, :], (SUBLANE, LANE))
    out = pl.pallas_call(
        _roll_probe_kernel,
        out_shape=jax.ShapeDtypeStruct((SUBLANE, LANE), jnp.float32),
    )(x)
    return bool(np.asarray(jax.device_get(out))[0, 1] == 0.0)


def _chip_vmem_bytes() -> int:
    try:
        v = int(getattr(pltpu.get_tpu_info(), "vmem_capacity_bytes"))
        if v > 0:
            return v
    except Exception:
        pass
    return 64 * 2 ** 20      # conservative fallback, valid on every generation


def _num_tensorcores() -> int:
    try:
        dev = jax.devices()[0]
    except Exception:
        return 1
    for attr in ("num_cores", "core_count"):
        v = getattr(dev, attr, None)
        if isinstance(v, (int, np.integer)) and int(v) > 0:
            return max(1, min(2, int(v)))
    return 1


# ----------------------------------------------------------------------------
# Kernel: full QAOA evolution + success probability, `bt` instances per step.
# ----------------------------------------------------------------------------
def _qaoa_kernel(gamma_ref, cb_ref, sb_ref, h_ref, hs_ref, out_ref,
                 re_ref, im_ref, *, n, layers, bt, chunk_rows, roll_is_np):
    """gamma/cb/sb : SMEM (layers,) f32
    h_ref, hs_ref : VMEM (bt, R, 128) f32 -- unsat counts / satisfying mask
    out_ref       : VMEM (bt, 8, 128) f32 -- per-instance success prob (broadcast)
    re_ref/im_ref : VMEM (R, 128) f32 scratch -- state planes
    """
    R = re_ref.shape[0]
    N = R * LANE
    C = chunk_rows
    nchunks = R // C
    inv_sqrt_n = float(1.0 / np.sqrt(float(N)))

    n_lane_bits = min(n, LANE_BITS)              # bits 0..6 : lane rolls
    n_roll_bits = min(n, LANE_BITS + 3)          # bits 7..9 : sublane rolls (chunk-local)
    pair_bits = list(range(LANE_BITS + 3, n))    # bits >=10 : aligned block swaps

    def shifted(v, delta, axis, size):
        # w[.., i, ..] = v[.., (i + delta) mod size, ..]  (XLU roll)
        s = (-delta) % size if roll_is_np else delta % size
        return pltpu.roll(v, s, axis)

    # Loop-invariant flip-parity planes, hoisted out of every loop (kept as
    # int32 so they cross fori_loop boundaries safely; one compare per qubit
    # per chunk rebuilds the boolean select mask).
    lane_id = lax.broadcasted_iota(jnp.int32, (C, LANE), 1)
    row_id = lax.broadcasted_iota(jnp.int32, (C, LANE), 0)
    lane_par = [lane_id & (1 << b) for b in range(n_lane_bits)]
    row_par = [row_id & (1 << (b - LANE_BITS)) for b in range(LANE_BITS, n_roll_bits)]

    def chunk_update(b, r0, g, cb, sb):
        """Cost phase + all chunk-local X mixers on rows [r0, r0 + C)."""
        re = re_ref[pl.ds(r0, C), :]
        im = im_ref[pl.ds(r0, C), :]
        hc = h_ref[b, pl.ds(r0, C), :]

        # cost unitary: amp *= exp(i * h * gamma)   (EUP transcendentals)
        ang = hc * g
        cph = jnp.cos(ang)
        sph = jnp.sin(ang)
        re, im = re * cph - im * sph, re * sph + im * cph

        # lane-bit X mixers (flip never crosses a 2^bit block -> wrap harmless)
        for qb in range(n_lane_bits):
            d = 1 << qb
            m = lane_par[qb] == 0
            fre = jnp.where(m, shifted(re, d, 1, LANE), shifted(re, -d, 1, LANE))
            fim = jnp.where(m, shifted(im, d, 1, LANE), shifted(im, -d, 1, LANE))
            re, im = cb * re - sb * fim, cb * im + sb * fre

        # low row-bit X mixers (flip distance 1, 2, 4 sublanes)
        for qb in range(LANE_BITS, n_roll_bits):
            d = 1 << (qb - LANE_BITS)
            m = row_par[qb - LANE_BITS] == 0
            fre = jnp.where(m, shifted(re, d, 0, C), shifted(re, -d, 0, C))
            fim = jnp.where(m, shifted(im, d, 0, C), shifted(im, -d, 0, C))
            re, im = cb * re - sb * fim, cb * im + sb * fre

        re_ref[pl.ds(r0, C), :] = re
        im_ref[pl.ds(r0, C), :] = im

    def pair_pass(bit, cb, sb):
        """X mixer for a row bit with flip distance >= 8 rows: sublane-aligned
        paired-block combine (no XLU rolls, no selects)."""
        d_r = 1 << (bit - LANE_BITS)     # flip distance in rows (>= 8)
        blk = min(d_r, C)                # rows handled per side per step
        qfac = d_r // blk                # power of two
        q_log2 = qfac.bit_length() - 1
        n_steps = R // (2 * blk)

        def body(t, carry):
            if qfac == 1:
                r_lo = t * (2 * d_r)
            else:
                sup = t >> q_log2
                off = t & (qfac - 1)
                r_lo = sup * (2 * d_r) + off * blk
            r_lo = pl.multiple_of(r_lo, blk)
            r_hi = pl.multiple_of(r_lo + d_r, blk)
            re_lo = re_ref[pl.ds(r_lo, blk), :]
            im_lo = im_ref[pl.ds(r_lo, blk), :]
            re_hi = re_ref[pl.ds(r_hi, blk), :]
            im_hi = im_ref[pl.ds(r_hi, blk), :]
            re_ref[pl.ds(r_lo, blk), :] = cb * re_lo - sb * im_hi
            im_ref[pl.ds(r_lo, blk), :] = cb * im_lo + sb * re_hi
            re_ref[pl.ds(r_hi, blk), :] = cb * re_hi - sb * im_lo
            im_ref[pl.ds(r_hi, blk), :] = cb * im_hi + sb * re_lo
            return carry

        lax.fori_loop(0, n_steps, body, 0)

    def run_instance(b):
        # |+>^n initial state: amplitude 1/sqrt(N) everywhere (purely real).
        re_ref[...] = jnp.full((R, LANE), inv_sqrt_n, dtype=jnp.float32)
        im_ref[...] = jnp.zeros((R, LANE), dtype=jnp.float32)

        def layer_body(layer, carry):
            g = gamma_ref[layer]
            cb = cb_ref[layer]
            sb = sb_ref[layer]
            if nchunks == 1:
                chunk_update(b, 0, g, cb, sb)
            else:
                def cbody(ci, c2):
                    chunk_update(b, pl.multiple_of(ci * C, C), g, cb, sb)
                    return c2
                lax.fori_loop(0, nchunks, cbody, 0)
            for bit in pair_bits:
                pair_pass(bit, cb, sb)
            return carry

        lax.fori_loop(0, layers, layer_body, 0)

        # success probability: sum over satisfying bitstrings of |amp|^2
        # (f32 tree-reduce per chunk, sequential f32 accumulation of partials)
        def red_body(ci, acc):
            r0 = pl.multiple_of(ci * C, C) if nchunks > 1 else 0
            re = re_ref[pl.ds(r0, C), :]
            im = im_ref[pl.ds(r0, C), :]
            m = hs_ref[b, pl.ds(r0, C), :]
            return acc + jnp.sum(m * (re * re + im * im))

        if nchunks == 1:
            prob = red_body(0, jnp.zeros((), jnp.float32))
        else:
            prob = lax.fori_loop(0, nchunks, red_body, jnp.zeros((), jnp.float32))

        out_ref[b] = jnp.full((SUBLANE, LANE), prob, dtype=jnp.float32)

    for b in range(bt):          # static per-step instance batching
        run_instance(b)


# ----------------------------------------------------------------------------
# Wrapper reproducing PytorchCircuit(num_vars, layers).forward(h, hS).
# ----------------------------------------------------------------------------
def qaoa_success_prob(h, hs_mask, gamma, beta, num_vars):
    """h       : (N,) or (B, N) float -- unsatisfied clauses per bitstring.
    hs_mask : same shape -- 1.0 iff the bitstring satisfies the problem
              (boolean-mask semantics of `circuit[hS]` in the torch module).
    Returns a scalar (unbatched input) or a (B,) vector of success probs.
    """
    n = int(num_vars)
    N = 1 << n
    # TODO(synk): num_vars < 10 (state smaller than one (8,128) tile per plane)
    # is not supported by this lane/sublane layout.
    assert n >= 10, "layout requires num_vars >= 10 (R = N/128 >= 8 rows)"
    R = N // LANE

    h = jnp.asarray(h, jnp.float32)
    hs = jnp.asarray(hs_mask, jnp.float32)
    single = h.ndim == 1
    if single:
        h = h[None]
        hs = hs[None]
    B = int(h.shape[0])
    assert h.shape == (B, N) and hs.shape == (B, N)

    gamma = jnp.asarray(gamma, jnp.float32)
    beta = jnp.asarray(beta, jnp.float32)
    layers = int(gamma.shape[0])
    cb = jnp.cos(beta)     # scalar transcendentals of the parameters: host glue
    sb = jnp.sin(beta)

    # Row chunk so the per-qubit roll/select/mul chain stays in vregs.
    C = min(R, 64)
    num_cores = _num_tensorcores()

    # Per-grid-step instance batching for small states (amortizes ~0.35us/step),
    # while keeping at least one grid step per TensorCore.
    bt_cap = max(1, min(8, 512 // R))
    bt = max(1, min(bt_cap, -(-B // num_cores)))
    grid_b = -(-B // bt)
    if num_cores > 1 and grid_b % num_cores:
        grid_b += num_cores - grid_b % num_cores
    B_pad = grid_b * bt
    if B_pad != B:
        pad = B_pad - B
        zeros = jnp.zeros((pad, N), jnp.float32)
        h = jnp.concatenate([h, zeros], axis=0)
        hs = jnp.concatenate([hs, zeros], axis=0)

    h3 = h.reshape(B_pad, R, LANE)
    hs3 = hs.reshape(B_pad, R, LANE)

    kernel = functools.partial(_qaoa_kernel, n=n, layers=layers, bt=bt,
                               chunk_rows=C, roll_is_np=_roll_matches_np())

    # VMEM budget: double-buffered h/hS blocks + state scratch + parity planes,
    # capped at ~85% of this chip's physical VMEM (64 MiB v7x, 128 MiB v5e/v6e).
    state_bytes = 2 * R * LANE * 4
    io_bytes = 2 * 2 * bt * R * LANE * 4 + 2 * bt * SUBLANE * LANE * 4
    misc_bytes = 10 * C * LANE * 4 + (4 << 20)
    cap = int(_chip_vmem_bytes() * 0.85)
    vmem_limit = int(min(cap, max(32 * 2 ** 20, state_bytes + io_bytes + misc_bytes)))

    flops = B_pad * (layers * (8 * N + 10 * N * n) + 4 * N)
    transcendentals = B_pad * layers * 2 * N
    bytes_accessed = B_pad * (2 * N + SUBLANE * LANE) * 4 + 3 * layers * 4

    out = pl.pallas_call(
        kernel,
        grid=(grid_b,),
        out_shape=jax.ShapeDtypeStruct((B_pad, SUBLANE, LANE), jnp.float32),
        in_specs=[
            pl.BlockSpec(memory_space=pltpu.MemorySpace.SMEM),   # gamma
            pl.BlockSpec(memory_space=pltpu.MemorySpace.SMEM),   # cos(beta)
            pl.BlockSpec(memory_space=pltpu.MemorySpace.SMEM),   # sin(beta)
            pl.BlockSpec((bt, R, LANE), lambda i: (i, 0, 0)),    # h
            pl.BlockSpec((bt, R, LANE), lambda i: (i, 0, 0)),    # hS mask
        ],
        out_specs=pl.BlockSpec((bt, SUBLANE, LANE), lambda i: (i, 0, 0)),
        scratch_shapes=[
            pltpu.VMEM((R, LANE), jnp.float32),   # state, real plane
            pltpu.VMEM((R, LANE), jnp.float32),   # state, imag plane
        ],
        compiler_params=pltpu.CompilerParams(
            dimension_semantics=("parallel",),
            vmem_limit_bytes=vmem_limit,
        ),
        cost_estimate=pl.CostEstimate(
            flops=int(flops),
            transcendentals=int(transcendentals),
            bytes_accessed=int(bytes_accessed),
        ),
    )(gamma, cb, sb, h3, hs3)

    probs = out[:B, 0, 0]
    return probs[0] if single else probs


# ----------------------------------------------------------------------------
# Pure-numpy reference of the torch module's forward pass.
# ----------------------------------------------------------------------------
def _numpy_reference(h, hs_mask, gamma, beta, num_vars):
    N = 1 << num_vars
    circ = np.full((N,), 1.0 / np.sqrt(N), dtype=np.complex128)
    idx = np.arange(N)
    for layer in range(len(gamma)):
        circ = np.exp(1j * np.float64(h) * float(gamma[layer])) * circ
        cbl = np.cos(float(beta[layer]))
        sbl = np.sin(float(beta[layer]))
        for i in range(num_vars):
            bit = num_vars - 1 - i
            circ = cbl * circ + 1j * sbl * circ[idx ^ (1 << bit)]
    return float(np.sum(np.float64(hs_mask) * (np.abs(circ) ** 2)))


if __name__ == "__main__":
    def run_case(num_vars, layers, batch, key):
        N = 1 << num_vars
        # h: unsatisfied clauses per bitstring; hS: 1 iff bitstring satisfies.
        h = jax.random.randint(key, (batch, N), 0, 5).astype(jnp.float32)
        hs_mask = (h == 0).astype(jnp.float32)
        # per-layer-distinct parameters (exercise dynamic SMEM scalar reads)
        gamma = -0.01 * (1.0 + jnp.arange(layers, dtype=jnp.float32))
        beta = 0.01 * (1.0 + jnp.arange(layers, dtype=jnp.float32))

        probs = jax.block_until_ready(
            qaoa_success_prob(h, hs_mask, gamma, beta, num_vars))

        h_np, hs_np = np.asarray(h), np.asarray(hs_mask)
        g_np, b_np = np.asarray(gamma), np.asarray(beta)
        for bi in range(batch):
            ref = _numpy_reference(h_np[bi], hs_np[bi], g_np, b_np, num_vars)
            got = float(probs[bi])
            assert abs(got - ref) < 1e-4 * max(1.0, abs(ref)) + 1e-5, \
                (num_vars, bi, got, ref)

    k0, k1 = jax.random.split(jax.random.PRNGKey(0))
    run_case(10, 2, 3, k0)   # chunk-local path only (R = 8), odd batch
    run_case(12, 2, 2, k1)   # exercises high row-bit pair-swap passes (bits 10, 11)
    print("KERNEL_OK")
</pallas_src>

<mosaic_0001>
module attributes {stable_mosaic.version = 11 : i64} {
  func.func @_roll_probe_kernel(%arg0: memref<8x128xf32, #tpu.memory_space<vmem>>, %arg1: memref<8x128xf32, #tpu.memory_space<vmem>>) attributes {dimension_semantics = [], scalar_prefetch = 0 : i64, scratch_operands = 0 : i64, tpu.core_type = #tpu.core_type<tc>} {
    %c0 = arith.constant 0 : index
    %c0_0 = arith.constant 0 : index
    %0 = vector.load %arg0[%c0, %c0_0] : memref<8x128xf32, #tpu.memory_space<vmem>>, vector<8x128xf32>
    %c1_i32 = arith.constant 1 : i32
    %1 = tpu.dynamic_rotate %0 by %c1_i32 dim 1 : vector<8x128xf32>, i32 -> vector<8x128xf32>
    %c0_1 = arith.constant 0 : index
    %c0_2 = arith.constant 0 : index
    %2 = vector.load %arg1[%c0_1, %c0_2] : memref<8x128xf32, #tpu.memory_space<vmem>>, vector<8x128xf32>
    tpu.vector_store %arg1[%c0_1, %c0_2], %1 {strides = array<i32>} : memref<8x128xf32, #tpu.memory_space<vmem>>, vector<8x128xf32>,
    return
  }
}

</mosaic_0001>

<bundles_post_ra>
// kernel: tpu_custom_call.1
= control target key start
LH: loop header
LB: loop body
LE: loop exit
PB: predicated region body
PF: predicated region fallthrough
CT: control target
= control target key end

     0   :  { %6 = vsyncpa [#allocation3], 0  ;;  %s106_s0 = inlined_call_operand.hbm [shape: f32[8,128], index: 0, kind: input, shape index: {}]   ;;  %s107_s1 = inlined_call_operand.hbm [shape: f32[8,128], index: 1, kind: output, shape index: {}]  }
   0x1   :  { %7 = vsyncpa [#allocation4], 0  ;;  %s87_s6 = smov [#allocation2]  }
   0x2   :  { %s14_s7 = sshll.u32 %s87_s6, 4  ;;  %s15_s7 = int_to_ptr.vmem [resolvable:$true] %s14_s7 }
   0x3   :  { %s51_s8 = scalar_lea.vmem %s15_s7, 128  ;;  %p56_p1 = scmp.lt.s32.totalorder %s15_s7, %s15_s7 }
   0x4   :  { %p52_p0 = scmp.ne.s32.totalorder %s15_s7, %s51_s8  ;;  %p57_p2 = scmp.lt.s32.totalorder %s51_s8, %s51_s8 }
   0x6   :  { %p58_p3 = por %p57_p2, %p56_p1 }
   0x8   :  { %p59_p4 = pnand %p58_p3, %p52_p0 }
   0xa   :  { %62 = shalt.err (!%p59_p4)
}
   0xb   :  { %17 = dma.hbm_to_vmem [thread:$0]  %s106_s0, 128, %s15_s7, [#allocation3]  }
   0xc   :  { %83 = dma.done.wait [#allocation3], 128  }
   0xd   :  { %84 = vsyncadd [#allocation3], 4294967168  ;;  %v21_v0 = vld [vmem:[#allocation2] sm:$0xff]  ;;  %s88_s11 = smov 1   ;;  %s89_s12 = smov [#allocation5]  }
   0xe   :  { %22 = vrot.lane.b32.xlu0 %v21_v0, %s88_s11  ;;  %s31_s13 = sshll.u32 %s89_s12, 4  ;;  %s32_s13 = int_to_ptr.vmem [resolvable:$true] %s31_s13 }
   0xf   :  { %s63_s14 = scalar_lea.vmem %s32_s13, 128  ;;  %p68_p6 = scmp.lt.s32.totalorder %s32_s13, %s32_s13 }
  0x10   :  { %p64_p5 = scmp.ne.s32.totalorder %s32_s13, %s63_s14  ;;  %p69_p7 = scmp.lt.s32.totalorder %s63_s14, %s63_s14 }
  0x12   :  { %p70_p8 = por %p69_p7, %p68_p6 }
  0x14   :  { %p71_p9 = pnand %p70_p8, %p64_p5 }
  0x80   :  { %v23_v1 = vpop.permute.xlu0 %22 }
  0x81   :  { %24 = vst [vmem:[#allocation5] sm:$0xff] %v23_v1 }
  0x82   :  { %74 = shalt.err (!%p71_p9)
}
  0x83   :  { %34 = dma.vmem_to_hbm [thread:$0]  %s32_s13, 128, %s107_s1, [#allocation4]  }
  0x84   :  { %85 = dma.done.wait [#allocation4], 128  }
  0x85   :  { %86 = vsyncadd [#allocation4], 4294967168 }
  0x86   :  { %38 = vsyncpa [#allocation3], 1 }
  0x87   :  { %39 = vsyncpa [#allocation4], 1 }

</bundles_post_ra>
